<compile_context>
chip_gen: v7x
topology: tpu7x:2x2x1
jax: 0.10.0
libtpu: 0.0.40
codegen_flags: <defaults>
</compile_context>

<pallas_src>
import jax
import jax.numpy as jnp
from jax.experimental import pallas as pl
from jax.experimental.pallas import tpu as pltpu


def arelu_kernel(alpha_ref, beta_ref, x_ref, o_ref):
    # Scalar parameters live in SMEM; cheap per-step, hidden under DMA.
    a = jnp.clip(alpha_ref[0], 0.01, 0.99)
    b = 1.0 + jax.nn.sigmoid(beta_ref[0])
    x = x_ref[...].astype(jnp.float32)
    # relu(x)*b - relu(-x)*a  ==  x * where(x >= 0, b, a)
    scale = jnp.where(x >= 0.0, b, a)
    o_ref[...] = (x * scale).astype(o_ref.dtype)


def arelu(x, alpha, beta, *, block_rows=256, lane_width=1024):
    """Apply AReLU elementwise. x: any shape; alpha/beta: shape-(1,) params."""
    orig_shape = x.shape
    orig_dtype = x.dtype

    flat = x.reshape(-1)
    n = flat.shape[0]

    # Prefer a wide lane-dense slab; fall back to 128 lanes if 1024 does not
    # divide the element count (minimizes / usually eliminates padding).
    width = lane_width if n % lane_width == 0 else 128
    padded = (n % width) != 0
    if padded:
        n_pad = pl.cdiv(n, width) * width
        flat = jnp.pad(flat, (0, n_pad - n))

    x2d = flat.reshape(-1, width)
    rows = x2d.shape[0]

    # Block rows: multiple of 8 (sublane), capped near the array extent for
    # small inputs; ragged last block is masked by Pallas.
    br = min(block_rows, ((rows + 7) // 8) * 8)
    grid = (pl.cdiv(rows, br),)

    out2d = pl.pallas_call(
        arelu_kernel,
        out_shape=jax.ShapeDtypeStruct((rows, width), orig_dtype),
        grid=grid,
        in_specs=[
            pl.BlockSpec(memory_space=pltpu.MemorySpace.SMEM),   # alpha
            pl.BlockSpec(memory_space=pltpu.MemorySpace.SMEM),   # beta
            pl.BlockSpec((br, width), lambda i: (i, 0)),         # x tile
        ],
        out_specs=pl.BlockSpec((br, width), lambda i: (i, 0)),
        compiler_params=pltpu.CompilerParams(
            dimension_semantics=("parallel",),   # enables 2-TC sharding on v7x
            vmem_limit_bytes=32 * 1024 * 1024,
        ),
    )(alpha, beta, x2d)

    if padded:
        return out2d.reshape(-1)[:n].reshape(orig_shape)
    return out2d.reshape(orig_shape)


def arelu_reference(x, alpha, beta):
    a = jnp.clip(alpha[0], 0.01, 0.99)
    b = 1.0 + jax.nn.sigmoid(beta[0])
    return jnp.maximum(x, 0.0) * b - jnp.maximum(-x, 0.0) * a


if __name__ == "__main__":
    key = jax.random.PRNGKey(0)
    # NCHW input, matching a typical conv activation map.
    x = jax.random.normal(key, (2, 4, 16, 16), dtype=jnp.float32)

    # Deterministic parameter init matching nn.Parameter(torch.tensor([...])).
    alpha = jnp.array([0.9], dtype=jnp.float32)
    beta = jnp.array([2.0], dtype=jnp.float32)

    out = jax.block_until_ready(arelu(x, alpha, beta))
    ref = arelu_reference(x, alpha, beta)
    assert out.shape == x.shape and out.dtype == x.dtype
    assert jnp.allclose(out, ref, atol=1e-5, rtol=1e-5), "mismatch vs reference"

    # Exercise the padded / ragged-block path (element count not a multiple
    # of 128) to make sure the un-pad logic stays correct.
    x2 = jax.random.normal(jax.random.PRNGKey(1), (3, 5, 7, 11), dtype=jnp.float32)
    out2 = jax.block_until_ready(arelu(x2, alpha, beta))
    ref2 = arelu_reference(x2, alpha, beta)
    assert out2.shape == x2.shape and out2.dtype == x2.dtype
    assert jnp.allclose(out2, ref2, atol=1e-5, rtol=1e-5), "mismatch (padded path)"

    print("KERNEL_OK")
</pallas_src>

<mosaic_0001>
module attributes {stable_mosaic.version = 11 : i64} {
  func.func @arelu_kernel(%arg0: i32, %arg1: memref<1xf32, #tpu.memory_space<smem>>, %arg2: memref<1xf32, #tpu.memory_space<smem>>, %arg3: memref<8x1024xf32, #tpu.memory_space<vmem>>, %arg4: memref<8x1024xf32, #tpu.memory_space<vmem>>) attributes {dimension_semantics = [#tpu.dimension_semantics<parallel>], iteration_bounds = array<i64: 1>, scalar_prefetch = 0 : i64, scratch_operands = 0 : i64, tpu.core_type = #tpu.core_type<tc>, window_params = [{transform_indices = @transform_0, window_bounds = array<i64: 1>}, {transform_indices = @transform_1, window_bounds = array<i64: 1>}, {transform_indices = @transform_2, window_bounds = array<i64: 8, 1024>}, {transform_indices = @transform_3, window_bounds = array<i64: 8, 1024>}]} {
    %c0 = arith.constant 0 : index
    %0 = memref.load %arg1[%c0] : memref<1xf32, #tpu.memory_space<smem>>
    %cst = arith.constant 0.00999999977 : f32
    %cst_0 = arith.constant 9.900000e-01 : f32
    %1 = arith.maximumf %cst, %0 : f32
    %2 = arith.minimumf %cst_0, %1 : f32
    %c0_1 = arith.constant 0 : index
    %3 = memref.load %arg2[%c0_1] : memref<1xf32, #tpu.memory_space<smem>>
    %4 = arith.negf %3 : f32
    %5 = math.exp %4 : f32
    %cst_2 = arith.constant 1.000000e+00 : f32
    %6 = arith.addf %cst_2, %5 : f32
    %7 = arith.divf %cst_2, %6 : f32
    %cst_3 = arith.constant 1.000000e+00 : f32
    %8 = arith.addf %cst_3, %7 : f32
    %c0_4 = arith.constant 0 : index
    %c0_5 = arith.constant 0 : index
    %9 = vector.load %arg3[%c0_4, %c0_5] : memref<8x1024xf32, #tpu.memory_space<vmem>>, vector<8x1024xf32>
    %cst_6 = arith.constant 0.000000e+00 : f32
    %10 = vector.broadcast %cst_6 : f32 to vector<8x1024xf32>
    %11 = arith.cmpf oge, %9, %10 : vector<8x1024xf32>
    %12 = vector.broadcast %8 : f32 to vector<8x1024xf32>
    %13 = vector.broadcast %2 : f32 to vector<8x1024xf32>
    %14 = arith.select %11, %12, %13 : vector<8x1024xi1>, vector<8x1024xf32>
    %15 = arith.mulf %9, %14 : vector<8x1024xf32>
    %c0_7 = arith.constant 0 : index
    %c0_8 = arith.constant 0 : index
    %16 = vector.load %arg4[%c0_7, %c0_8] : memref<8x1024xf32, #tpu.memory_space<vmem>>, vector<8x1024xf32>
    tpu.vector_store %arg4[%c0_7, %c0_8], %15 {strides = array<i32>} : memref<8x1024xf32, #tpu.memory_space<vmem>>, vector<8x1024xf32>,
    return
  }
  func.func @transform_0(%arg0: i32) -> i32 {
    %c0_i32 = arith.constant 0 : i32
    %c0_i32_0 = arith.constant 0 : i32
    return %c0_i32 : i32
  }
  func.func @transform_1(%arg0: i32) -> i32 {
    %c0_i32 = arith.constant 0 : i32
    %c0_i32_0 = arith.constant 0 : i32
    return %c0_i32 : i32
  }
  func.func @transform_2(%arg0: i32) -> (i32, i32) {
    %c0_i32 = arith.constant 0 : i32
    %c0_i32_0 = arith.constant 0 : i32
    return %arg0, %c0_i32 : i32, i32
  }
  func.func @transform_3(%arg0: i32) -> (i32, i32) {
    %c0_i32 = arith.constant 0 : i32
    %c0_i32_0 = arith.constant 0 : i32
    return %arg0, %c0_i32 : i32, i32
  }
}

</mosaic_0001>

<bundles_post_ra>
// kernel: tpu_custom_call.1
= control target key start
LH: loop header
LB: loop body
LE: loop exit
PB: predicated region body
PF: predicated region fallthrough
CT: control target
= control target key end

     0   :  { %10 = vsyncpa [#allocation5], 0  ;;  %s228_s0 = inlined_call_operand.<no memory space> [shape: f32[1], index: 0, kind: input, shape index: {}]   ;;  %s229_s1 = inlined_call_operand.<no memory space> [shape: f32[1], index: 1, kind: input, shape index: {}]   ;;  %s230_s2 = inlined_call_operand.hbm [shape: f32[2,1024], index: 2, kind: input, shape index: {}]   ;;  %s231_s3 = inlined_call_operand.hbm [shape: f32[2,1024], index: 3, kind: output, shape index: {}]  }
   0x1   :  { %11 = vsyncpa [#allocation6], 0 }
   0x2   :  { %20 = vsyncadd [#allocation5], 768  ;;  %s166_s12 = smov [#allocation4]   ;;  %s118_s16 = scalar_lea.hbm %s230_s2, 256 }
   0x3   :  { %s21_s13 = sshll.u32 %s166_s12, 4  ;;  %p119_p0 = scmp.ne.s32.totalorder %s230_s2, %s118_s16  ;;  %s22_s13 = int_to_ptr.vmem [resolvable:$true] %s21_s13 }
   0x4   :  { %p122_p1 = scmp.lt.u32.totalorder %s118_s16, %s230_s2 }
   0x6   :  { %p124_p2 = pnand %p122_p1, %p119_p0 }
   0x8   :  { %127 = shalt.err (!%p124_p2)
}
   0x9   :  { %s128_s21 = scalar_lea.vmem %s22_s13, 256  ;;  %s132_s22 = scalar_lea.vmem %s22_s13, 1024 }
   0xa   :  { %p129_p3 = scmp.ne.s32.totalorder %s22_s13, %s128_s21  ;;  %p133_p4 = scmp.lt.s32.totalorder %s22_s13, %s22_s13 }
   0xb   :  { %p134_p5 = scmp.lt.s32.totalorder %s132_s22, %s128_s21 }
   0xd   :  { %p135_p6 = por %p134_p5, %p133_p4 }
   0xf   :  { %p136_p7 = pnand %p135_p6, %p129_p3 }
  0x11   :  { %139 = shalt.err (!%p136_p7)
}
  0x12   :  { %s167_s23 = smov 256   ;;  %s168_s24 = smov 16  }
  0x13   :  { %27 = dma.hbm_to_vmem [thread:$0]  %s230_s2, 256, %s22_s13, [#allocation5], %s167_s23, %s167_s23, %s168_s24  }
  0x14   :  { %s35_s29 = sxor.u32 2147483648, %s229_s1 }
  0x15   :  { %162 = dma.done.wait [#allocation5], 1024  }
  0x16   :  { %163 = vsyncadd [#allocation5], 4294966272  ;;  %v36_v0 = vstv %s35_s29  ;;  %s169_s5 = smov 0.01   ;;  %s170_s8 = smov 0.99  }
  0x17   :  { %v37_v1 = vmul.f32 1.442695, %v36_v0  ;;  %s32_s7 = smax.f32 %s169_s5, %s228_s0  ;;  %v45_v5 = vld [vmem:[#allocation4] sm:$0xff]  ;;  %v46_v6 = vld [vmem:[#allocation4 + $0x8] sm:$0xff]  ;;  %v47_v7 = vld [vmem:[#allocation4 + $0x10] sm:$0xff] }
  0x18   :  { %s33_s1 = smin.f32 %s170_s8, %s32_s7  ;;  %v48_v8 = vld [vmem:[#allocation4 + $0x18] sm:$0xff]  ;;  %v49_v9 = vld [vmem:[#allocation4 + $0x20] sm:$0xff]  ;;  %v50_v10 = vld [vmem:[#allocation4 + $0x28] sm:$0xff]  ;;  %vm53_vm0 = vcmp.ge.f32.partialorder %v45_v5, 0.0  ;;  %vm54_vm1 = vcmp.ge.f32.partialorder %v46_v6, 0.0  ;;  %vm55_vm2 = vcmp.ge.f32.partialorder %v47_v7, 0.0 }
  0x19   :  { %114 = vpow2.f32 %v37_v1  ;;  %v51_v11 = vld [vmem:[#allocation4 + $0x30] sm:$0xff]  ;;  %v52_v12 = vld [vmem:[#allocation4 + $0x38] sm:$0xff]  ;;  %v62_v13 = vstv %s33_s1  ;;  %vm56_vm3 = vcmp.ge.f32.partialorder %v48_v8, 0.0  ;;  %vm57_vm4 = vcmp.ge.f32.partialorder %v49_v9, 0.0 }
  0x1a   :  { %vm58_vm5 = vcmp.ge.f32.partialorder %v50_v10, 0.0  ;;  %vm59_vm6 = vcmp.ge.f32.partialorder %v51_v11, 0.0  ;;  %vm60_vm7 = vcmp.ge.f32.partialorder %v52_v12, 0.0 }
  0x23   :  { %v115_v2 = vpop.eup %114 }
  0x24   :  { %104 = vpush %v115_v2 }
  0x55   :  { %s105_s30 = spop %104 }
  0x56   :  { %s40_s4 = sadd.f32 1.0, %s105_s30 }
  0x58   :  { %v41_v3 = vstv %s40_s4 }
  0x59   :  { %116 = vrcp.f32 %v41_v3 }
  0x63   :  { %v117_v4 = vpop.eup %116 }
  0x64   :  { %106 = vpush %v117_v4 }
  0x95   :  { %s107_s9 = spop %106 }
  0x96   :  { %s44_s10 = sadd.f32 1.0, %s107_s9 }
  0x98   :  { %v61_v14 = vstv %s44_s10 }
  0x99   :  { %v63_v15 = vsel %vm53_vm0, %v61_v14, %v62_v13  ;;  %v64_v16 = vsel %vm54_vm1, %v61_v14, %v62_v13  ;;  %v65_v17 = vsel %vm55_vm2, %v61_v14, %v62_v13  ;;  %v66_v18 = vsel %vm56_vm3, %v61_v14, %v62_v13 }
  0x9a   :  { %v67_v19 = vsel %vm57_vm4, %v61_v14, %v62_v13  ;;  %v68_v20 = vsel %vm58_vm5, %v61_v14, %v62_v13  ;;  %v69_v21 = vsel %vm59_vm6, %v61_v14, %v62_v13  ;;  %v70_v22 = vsel %vm60_vm7, %v61_v14, %v62_v13 }
  0x9b   :  { %v71_v23 = vmul.f32 %v63_v15, %v45_v5  ;;  %v72_v24 = vmul.f32 %v64_v16, %v46_v6  ;;  %v73_v25 = vmul.f32 %v65_v17, %v47_v7  ;;  %v74_v26 = vmul.f32 %v66_v18, %v48_v8 }
  0x9c   :  { %v75_v27 = vmul.f32 %v67_v19, %v49_v9  ;;  %v76_v28 = vmul.f32 %v68_v20, %v50_v10  ;;  %v77_v29 = vmul.f32 %v69_v21, %v51_v11  ;;  %v78_v30 = vmul.f32 %v70_v22, %v52_v12 }
  0x9d   :  { %79 = vst [vmem:[#allocation7] sm:$0xff] %v71_v23  ;;  %80 = vst [vmem:[#allocation7 + $0x8] sm:$0xff] %v72_v24 }
  0x9e   :  { %81 = vst [vmem:[#allocation7 + $0x10] sm:$0xff] %v73_v25  ;;  %82 = vst [vmem:[#allocation7 + $0x18] sm:$0xff] %v74_v26 }
  0x9f   :  { %83 = vst [vmem:[#allocation7 + $0x20] sm:$0xff] %v75_v27  ;;  %84 = vst [vmem:[#allocation7 + $0x28] sm:$0xff] %v76_v28 }
  0xa0   :  { %85 = vst [vmem:[#allocation7 + $0x30] sm:$0xff] %v77_v29  ;;  %86 = vst [vmem:[#allocation7 + $0x38] sm:$0xff] %v78_v30 }
  0xa1   :  { %91 = vsyncadd [#allocation6], 768  ;;  %s171_s0 = smov [#allocation7]  }
  0xa2   :  { %s92_s11 = sshll.u32 %s171_s0, 4  ;;  %s93_s11 = int_to_ptr.vmem [resolvable:$true] %s92_s11 }
  0xa3   :  { %s140_s12 = scalar_lea.vmem %s93_s11, 256  ;;  %s144_s13 = scalar_lea.vmem %s93_s11, 1024 }
  0xa4   :  { %p141_p8 = scmp.ne.s32.totalorder %s93_s11, %s140_s12  ;;  %p145_p9 = scmp.lt.s32.totalorder %s93_s11, %s93_s11 }
  0xa5   :  { %p146_p10 = scmp.lt.s32.totalorder %s144_s13, %s140_s12 }
  0xa7   :  { %p147_p11 = por %p146_p10, %p145_p9 }
  0xa9   :  { %p148_p12 = pnand %p147_p11, %p141_p8 }
  0xab   :  { %151 = shalt.err (!%p148_p12)
}
  0xac   :  { %s152_s16 = scalar_lea.hbm %s231_s3, 256 }
  0xad   :  { %p153_p13 = scmp.ne.s32.totalorder %s231_s3, %s152_s16  ;;  %p156_p0 = scmp.lt.u32.totalorder %s152_s16, %s231_s3 }
  0xaf   :  { %p158_p1 = pnand %p156_p0, %p153_p13 }
  0xb1   :  { %161 = shalt.err (!%p158_p1)
}
  0xb2   :  { %98 = dma.vmem_to_hbm [thread:$0]  %s93_s11, 256, %s231_s3, [#allocation6], %s167_s23, %s167_s23, %s168_s24  }
  0xb3   :  { %164 = dma.done.wait [#allocation6], 1024  }
  0xb4   :  { %165 = vsyncadd [#allocation6], 4294966272 }
  0xb5   :  { %102 = vsyncpa [#allocation5], 1 }
  0xb6   :  { %103 = vsyncpa [#allocation6], 1 }

</bundles_post_ra>
